<compile_context>
chip_gen: v7x
topology: tpu7x:2x2x1
jax: 0.10.0
libtpu: 0.0.40
codegen_flags: <defaults>
</compile_context>

<pallas_src>
import functools

import jax
import jax.numpy as jnp
import numpy as np
from jax import lax
from jax.experimental import pallas as pl
from jax.experimental.pallas import tpu as pltpu


def _round_up(n, m):
    return ((n + m - 1) // m) * m


def _make_decoder_kernel(T, B, Bp, H, counts):
    """Build the GRU-decoder kernel with all static config baked in.

    counts[t] = number of (real, descending-length) sequences still valid at step t.
    """

    def kernel(emb_ref, cnn_ref, wc_ref, bc_ref,
               wih_e_ref, wih_c_ref, bih_ref,
               whh_ref, bhhn_ref, wcls_ref, bcls_ref, out_ref):
        # ---------------- pre-loop: everything off the serial critical path ------
        # linear_cnn : (Bp, cnn_size) @ (cnn_size, E) + b
        cnn_lin = jnp.dot(cnn_ref[...], wc_ref[...],
                          preferred_element_type=jnp.float32) + bc_ref[...]
        # time-invariant half of the GRU input projection; b_ih (and b_hh for the
        # r/z gates) are folded into bih_ref by prepare_params.
        gi_cnn = jnp.dot(cnn_lin, wih_c_ref[...],
                         preferred_element_type=jnp.float32) + bih_ref[...]       # (Bp, Wgp)
        # time-varying half for ALL timesteps in a single well-shaped matmul.
        gi_emb = jnp.dot(emb_ref[...], wih_e_ref[...],
                         preferred_element_type=jnp.float32)                      # (T*Bp, Wgp)

        whh = whh_ref[...]            # (H, Wgp)  packed r|z|n columns
        bhh_n = bhhn_ref[...]         # (1, H)    n-gate hidden bias (stays inside r*(...))
        row_id = lax.broadcasted_iota(jnp.int32, (Bp, H), 0)

        # ---------------- recurrence: only h @ W_hh on the critical path ---------
        h = jnp.zeros((Bp, H), jnp.float32)
        acts = []
        for t in range(T):                      # static T -> fully unrolled at trace time
            gi = gi_emb[t * Bp:(t + 1) * Bp, :] + gi_cnn       # independent of h
            gh = jnp.dot(h, whh, preferred_element_type=jnp.float32)   # (Bp, Wgp)
            r = jax.nn.sigmoid(gi[:, 0:H] + gh[:, 0:H])
            z = jax.nn.sigmoid(gi[:, H:2 * H] + gh[:, H:2 * H])
            n = jnp.tanh(gi[:, 2 * H:3 * H] + r * (gh[:, 2 * H:3 * H] + bhh_n))
            h_new = (1.0 - z) * n + z * h
            cnt = counts[t]                     # compile-time constant (lens are static)
            if cnt >= B:
                # every real row is still valid: no blend at all.
                h = h_new
                acts.append(jnp.maximum(h_new, 0.0))
            else:
                valid = row_id < cnt            # lens descending -> rows [0, cnt) valid
                h = jnp.where(valid, h_new, h)  # freeze h past each sequence's length
                acts.append(jnp.where(valid, jnp.maximum(h_new, 0.0),
                                      jnp.zeros_like(h_new)))

        # ---------------- post-loop classifier: one lane-dense flat store --------
        acts_flat = jnp.concatenate(acts, axis=0)                                 # (T*Bp, H)
        logits = jnp.dot(acts_flat, wcls_ref[...],
                         preferred_element_type=jnp.float32) + bcls_ref[...]      # (T*Bp, Cp)
        out_ref[...] = logits

    return kernel


def init_params(key, embed_size, hidden_size, cnn_size, n_classes):
    E, H = embed_size, hidden_size
    ks = jax.random.split(key, 12)

    def u(k, shape, scale=0.1):
        return jax.random.uniform(k, shape, jnp.float32, -scale, scale)

    # PyTorch-layout weights, then transposed for (in, out) matmuls.
    W_ih = u(ks[0], (3 * H, 2 * E))     # gru.weight_ih_l0  (rows: r, z, n)
    W_hh = u(ks[1], (3 * H, H))         # gru.weight_hh_l0
    W_cnn = u(ks[2], (E, cnn_size))     # linear_cnn.weight
    W_cls = u(ks[3], (n_classes, H))    # linear_class.weight

    return {
        "sos": u(ks[4], (1, 1, E)),                 # sos_param (xavier-init stand-in)
        "embed": u(ks[5], (n_classes, E)),          # embed.weight
        "W_cnn": jnp.transpose(W_cnn),              # (cnn_size, E)
        "b_cnn": u(ks[6], (1, E)),
        "W_ih_emb": jnp.transpose(W_ih)[:E, :],     # (E, 3H)  emb half of the concat
        "W_ih_cnn": jnp.transpose(W_ih)[E:, :],     # (E, 3H)  cnn half of the concat
        "b_ih": u(ks[7], (1, 3 * H)),
        "W_hh": jnp.transpose(W_hh),                # (H, 3H)
        "b_hh": u(ks[8], (1, 3 * H)),
        "W_cls": jnp.transpose(W_cls),              # (H, C)
        "b_cls": u(ks[9], (1, n_classes)),
    }


def prepare_params(params):
    """One-time weight packing / padding + bias folding (hoisted off the per-call path)."""
    H = params["W_hh"].shape[0]
    C = params["W_cls"].shape[1]
    Wgp = _round_up(3 * H, 128)     # packed gate width, padded to a lane-tile multiple
    Cp = _round_up(C, 128)

    def pad_last(a, target):
        return jnp.pad(a, [(0, 0)] * (a.ndim - 1) + [(0, target - a.shape[-1])])

    b_ih, b_hh = params["b_ih"], params["b_hh"]
    # b_hh for the r/z gates folds into the precomputed input projection; the
    # n-gate's b_hh must remain inside r * (h @ W_hh_n + b_hh_n).
    b_fold = jnp.concatenate([b_ih[:, :2 * H] + b_hh[:, :2 * H], b_ih[:, 2 * H:]], axis=1)

    return {
        "sos": params["sos"],
        "embed": params["embed"],                       # (n_classes, E)
        "W_cnn": params["W_cnn"],                       # (cnn_size, E)
        "b_cnn": params["b_cnn"],                       # (1, E)
        "W_ih_emb": pad_last(params["W_ih_emb"], Wgp),  # (E, Wgp)  packed gates
        "W_ih_cnn": pad_last(params["W_ih_cnn"], Wgp),  # (E, Wgp)
        "b_ih_fold": pad_last(b_fold, Wgp),             # (1, Wgp)
        "W_hh": pad_last(params["W_hh"], Wgp),          # (H, Wgp)
        "b_hh_n": b_hh[:, 2 * H:],                      # (1, H)
        "W_cls": pad_last(params["W_cls"], Cp),         # (H, Cp)
        "b_cls": pad_last(params["b_cls"], Cp),         # (1, Cp)
    }


@functools.partial(jax.jit, static_argnames=("lens",))
def decoder_forward(prepped, cnn_feat, labels, *, lens):
    """PyTorch DecoderRNN.forward(cnn_feat, labels, lens) -> (B, max(lens), n_classes)."""
    lens = tuple(int(l) for l in lens)
    B, L = labels.shape
    E = prepped["embed"].shape[1]
    C = prepped["embed"].shape[0]
    H = prepped["W_hh"].shape[0]
    Cp = prepped["W_cls"].shape[1]

    T = max(lens)
    assert T <= L + 1, "lens must not exceed label length + 1 (sos)"
    assert all(lens[i] >= lens[i + 1] for i in range(B - 1)), "pack() requires descending lens"

    Bp = _round_up(max(B, 8), 8)                              # sublane-tile batch padding
    counts = tuple(sum(1 for l in lens if l > t) for t in range(T))

    # ---- per-call data prep (weight prep lives in prepare_params) --------------
    cnn2d = cnn_feat.reshape(B, -1).astype(jnp.float32)       # .squeeze()
    cnn2d = jnp.pad(cnn2d, ((0, Bp - B), (0, 0)))             # (Bp, cnn_size)

    emb = jnp.take(prepped["embed"], labels, axis=0)          # (B, L, E)
    sos = jnp.broadcast_to(prepped["sos"].reshape(1, 1, E), (B, 1, E))
    emb = jnp.concatenate([sos, emb], axis=1)[:, :T, :]       # (B, T, E)
    emb_tm = jnp.transpose(emb, (1, 0, 2)).astype(jnp.float32)
    emb_tm = jnp.pad(emb_tm, ((0, 0), (0, Bp - B), (0, 0)))   # (T, Bp, E)
    emb_flat = emb_tm.reshape(T * Bp, E)                      # flat 2D kernel input

    kernel = _make_decoder_kernel(T, B, Bp, H, counts)
    vspec = pl.BlockSpec(memory_space=pltpu.MemorySpace.VMEM)
    # NOTE: whole-array resident (gridless) is fine at these sizes; a T/batch grid,
    # bf16 scratch and an explicit vmem_limit would be needed before scaling
    # H/T/B onto v7x's 64 MiB VMEM / 2 TensorCores.
    out_flat = pl.pallas_call(
        kernel,
        out_shape=jax.ShapeDtypeStruct((T * Bp, Cp), jnp.float32),
        in_specs=[vspec] * 11,
        out_specs=vspec,
    )(emb_flat, cnn2d,
      prepped["W_cnn"], prepped["b_cnn"],
      prepped["W_ih_emb"], prepped["W_ih_cnn"], prepped["b_ih_fold"],
      prepped["W_hh"], prepped["b_hh_n"],
      prepped["W_cls"], prepped["b_cls"])

    # flat (T*Bp, Cp) -> (B, T, C)
    out = out_flat.reshape(T, Bp, Cp)[:, :B, :C]
    return jnp.transpose(out, (1, 0, 2))


def decoder_forward_ref(params, cnn_feat, labels, lens):
    """Pure-JAX reference replicating the PyTorch forward exactly."""
    lens = [int(l) for l in lens]
    B, L = labels.shape
    E = params["embed"].shape[1]
    H = params["W_hh"].shape[0]

    cnn2d = cnn_feat.reshape(B, -1).astype(jnp.float32)
    emb = jnp.take(params["embed"], labels, axis=0)
    sos = jnp.broadcast_to(params["sos"].reshape(1, 1, E), (B, 1, E))
    emb = jnp.concatenate([sos, emb], axis=1)                          # (B, L+1, E)

    cnn_lin = cnn2d @ params["W_cnn"] + params["b_cnn"]                # (B, E)
    T = max(lens)
    x = jnp.concatenate(
        [emb[:, :T, :], jnp.broadcast_to(cnn_lin[:, None, :], (B, T, E))], axis=2)

    W_ih = jnp.concatenate([params["W_ih_emb"], params["W_ih_cnn"]], axis=0)  # (2E, 3H)
    lens_arr = np.asarray(lens)
    h = jnp.zeros((B, H), jnp.float32)
    outs = []
    for t in range(T):
        gi = x[:, t, :] @ W_ih + params["b_ih"]
        gh = h @ params["W_hh"] + params["b_hh"]
        r = jax.nn.sigmoid(gi[:, :H] + gh[:, :H])
        z = jax.nn.sigmoid(gi[:, H:2 * H] + gh[:, H:2 * H])
        n = jnp.tanh(gi[:, 2 * H:] + r * gh[:, 2 * H:])
        h_new = (1.0 - z) * n + z * h
        valid = jnp.asarray(t < lens_arr)[:, None]
        outs.append(jnp.where(valid, h_new, 0.0))
        h = jnp.where(valid, h_new, h)
    gru_out = jnp.stack(outs, axis=1)                                  # (B, T, H)
    return jax.nn.relu(gru_out) @ params["W_cls"] + params["b_cls"]


if __name__ == "__main__":
    embed_size, hidden_size, cnn_size, n_classes = 32, 32, 64, 16
    B, L = 4, 7                       # seq len L labels -> T = L + 1 after SOS
    lens = (8, 7, 6, 5)               # descending, as required by pack()

    key = jax.random.PRNGKey(0)
    k_par, k_cnn, k_lab = jax.random.split(key, 3)
    params = init_params(k_par, embed_size, hidden_size, cnn_size, n_classes)
    prepped = prepare_params(params)   # one-time weight packing / padding

    cnn_feat = jax.random.normal(k_cnn, (B, cnn_size, 1, 1), jnp.float32)  # NCHW
    labels = jax.random.randint(k_lab, (B, L), 0, n_classes, jnp.int32)

    out = decoder_forward(prepped, cnn_feat, labels, lens=lens)
    out = jax.block_until_ready(out)

    ref = decoder_forward_ref(params, cnn_feat, labels, lens)
    np.testing.assert_allclose(np.asarray(out), np.asarray(ref), rtol=2e-5, atol=2e-5)
    assert out.shape == (B, max(lens), n_classes)

    print("KERNEL_OK")
</pallas_src>

<mosaic_0001>
module attributes {stable_mosaic.version = 11 : i64} {
  func.func @kernel(%arg0: memref<64x32xf32, #tpu.memory_space<vmem>>, %arg1: memref<8x64xf32, #tpu.memory_space<vmem>>, %arg2: memref<64x32xf32, #tpu.memory_space<vmem>>, %arg3: memref<1x32xf32, #tpu.memory_space<vmem>>, %arg4: memref<32x128xf32, #tpu.memory_space<vmem>>, %arg5: memref<32x128xf32, #tpu.memory_space<vmem>>, %arg6: memref<1x128xf32, #tpu.memory_space<vmem>>, %arg7: memref<32x128xf32, #tpu.memory_space<vmem>>, %arg8: memref<1x32xf32, #tpu.memory_space<vmem>>, %arg9: memref<32x128xf32, #tpu.memory_space<vmem>>, %arg10: memref<1x128xf32, #tpu.memory_space<vmem>>, %arg11: memref<64x128xf32, #tpu.memory_space<vmem>>) attributes {dimension_semantics = [], scalar_prefetch = 0 : i64, scratch_operands = 0 : i64, tpu.core_type = #tpu.core_type<tc>} {
    %c0 = arith.constant 0 : index
    %c0_0 = arith.constant 0 : index
    %0 = vector.load %arg1[%c0, %c0_0] : memref<8x64xf32, #tpu.memory_space<vmem>>, vector<8x64xf32>
    %c0_1 = arith.constant 0 : index
    %c0_2 = arith.constant 0 : index
    %1 = vector.load %arg2[%c0_1, %c0_2] : memref<64x32xf32, #tpu.memory_space<vmem>>, vector<64x32xf32>
    %cst = arith.constant dense<0.000000e+00> : vector<8x32xf32>
    %2 = tpu.matmul %0, %1, %cst {dimension_numbers = #tpu.dot_dimension_numbers<[1], [0], [0], [1], [0, 0, 1, 1], [], []>} : vector<8x64xf32>, vector<64x32xf32>, vector<8x32xf32> -> vector<8x32xf32>
    %c0_3 = arith.constant 0 : index
    %c0_4 = arith.constant 0 : index
    %3 = vector.load %arg3[%c0_3, %c0_4] : memref<1x32xf32, #tpu.memory_space<vmem>>, vector<1x32xf32>
    %4 = vector.broadcast %3 : vector<1x32xf32> to vector<8x32xf32>
    %5 = arith.addf %2, %4 : vector<8x32xf32>
    %c0_5 = arith.constant 0 : index
    %c0_6 = arith.constant 0 : index
    %6 = vector.load %arg5[%c0_5, %c0_6] : memref<32x128xf32, #tpu.memory_space<vmem>>, vector<32x128xf32>
    %cst_7 = arith.constant dense<0.000000e+00> : vector<8x128xf32>
    %7 = tpu.matmul %5, %6, %cst_7 {dimension_numbers = #tpu.dot_dimension_numbers<[1], [0], [0], [1], [0, 0, 1, 1], [], []>} : vector<8x32xf32>, vector<32x128xf32>, vector<8x128xf32> -> vector<8x128xf32>
    %c0_8 = arith.constant 0 : index
    %c0_9 = arith.constant 0 : index
    %8 = vector.load %arg6[%c0_8, %c0_9] : memref<1x128xf32, #tpu.memory_space<vmem>>, vector<1x128xf32>
    %9 = vector.broadcast %8 : vector<1x128xf32> to vector<8x128xf32>
    %10 = arith.addf %7, %9 : vector<8x128xf32>
    %c0_10 = arith.constant 0 : index
    %c0_11 = arith.constant 0 : index
    %11 = vector.load %arg0[%c0_10, %c0_11] : memref<64x32xf32, #tpu.memory_space<vmem>>, vector<64x32xf32>
    %c0_12 = arith.constant 0 : index
    %c0_13 = arith.constant 0 : index
    %12 = vector.load %arg4[%c0_12, %c0_13] : memref<32x128xf32, #tpu.memory_space<vmem>>, vector<32x128xf32>
    %cst_14 = arith.constant dense<0.000000e+00> : vector<64x128xf32>
    %13 = tpu.matmul %11, %12, %cst_14 {dimension_numbers = #tpu.dot_dimension_numbers<[1], [0], [0], [1], [0, 0, 1, 1], [], []>} : vector<64x32xf32>, vector<32x128xf32>, vector<64x128xf32> -> vector<64x128xf32>
    %c0_15 = arith.constant 0 : index
    %c0_16 = arith.constant 0 : index
    %14 = vector.load %arg7[%c0_15, %c0_16] : memref<32x128xf32, #tpu.memory_space<vmem>>, vector<32x128xf32>
    %c0_17 = arith.constant 0 : index
    %c0_18 = arith.constant 0 : index
    %15 = vector.load %arg8[%c0_17, %c0_18] : memref<1x32xf32, #tpu.memory_space<vmem>>, vector<1x32xf32>
    %16 = tpu.iota {dimensions = array<i32: 0>} : vector<8x32xi32>
    %cst_19 = arith.constant 0.000000e+00 : f32
    %17 = vector.broadcast %cst_19 : f32 to vector<8x32xf32>
    %18 = vector.extract_strided_slice %13 {offsets = [0, 0], sizes = [8, 128], strides = [1, 1]} : vector<64x128xf32> to vector<8x128xf32>
    %19 = arith.addf %18, %10 : vector<8x128xf32>
    %cst_20 = arith.constant dense<0.000000e+00> : vector<8x128xf32>
    %20 = tpu.matmul %17, %14, %cst_20 {dimension_numbers = #tpu.dot_dimension_numbers<[1], [0], [0], [1], [0, 0, 1, 1], [], []>} : vector<8x32xf32>, vector<32x128xf32>, vector<8x128xf32> -> vector<8x128xf32>
    %21 = vector.extract_strided_slice %19 {offsets = [0, 0], sizes = [8, 32], strides = [1, 1]} : vector<8x128xf32> to vector<8x32xf32>
    %22 = vector.extract_strided_slice %20 {offsets = [0, 0], sizes = [8, 32], strides = [1, 1]} : vector<8x128xf32> to vector<8x32xf32>
    %23 = arith.addf %21, %22 : vector<8x32xf32>
    %24 = arith.negf %23 : vector<8x32xf32>
    %25 = math.exp %24 : vector<8x32xf32>
    %cst_21 = arith.constant 1.000000e+00 : f32
    %26 = vector.broadcast %cst_21 : f32 to vector<8x32xf32>
    %27 = arith.addf %26, %25 : vector<8x32xf32>
    %28 = arith.divf %26, %27 : vector<8x32xf32>
    %29 = vector.extract_strided_slice %19 {offsets = [0, 32], sizes = [8, 32], strides = [1, 1]} : vector<8x128xf32> to vector<8x32xf32>
    %30 = vector.extract_strided_slice %20 {offsets = [0, 32], sizes = [8, 32], strides = [1, 1]} : vector<8x128xf32> to vector<8x32xf32>
    %31 = arith.addf %29, %30 : vector<8x32xf32>
    %32 = arith.negf %31 : vector<8x32xf32>
    %33 = math.exp %32 : vector<8x32xf32>
    %cst_22 = arith.constant 1.000000e+00 : f32
    %34 = vector.broadcast %cst_22 : f32 to vector<8x32xf32>
    %35 = arith.addf %34, %33 : vector<8x32xf32>
    %36 = arith.divf %34, %35 : vector<8x32xf32>
    %37 = vector.extract_strided_slice %19 {offsets = [0, 64], sizes = [8, 32], strides = [1, 1]} : vector<8x128xf32> to vector<8x32xf32>
    %38 = vector.extract_strided_slice %20 {offsets = [0, 64], sizes = [8, 32], strides = [1, 1]} : vector<8x128xf32> to vector<8x32xf32>
    %39 = vector.broadcast %15 : vector<1x32xf32> to vector<8x32xf32>
    %40 = arith.addf %38, %39 : vector<8x32xf32>
    %41 = arith.mulf %28, %40 : vector<8x32xf32>
    %42 = arith.addf %37, %41 : vector<8x32xf32>
    %43 = math.tanh %42 : vector<8x32xf32>
    %cst_23 = arith.constant 1.000000e+00 : f32
    %44 = vector.broadcast %cst_23 : f32 to vector<8x32xf32>
    %45 = arith.subf %44, %36 : vector<8x32xf32>
    %46 = arith.mulf %45, %43 : vector<8x32xf32>
    %47 = arith.mulf %36, %17 : vector<8x32xf32>
    %48 = arith.addf %46, %47 : vector<8x32xf32>
    %cst_24 = arith.constant 0.000000e+00 : f32
    %49 = vector.broadcast %cst_24 : f32 to vector<8x32xf32>
    %50 = arith.maximumf %48, %49 : vector<8x32xf32>
    %51 = vector.extract_strided_slice %13 {offsets = [8, 0], sizes = [8, 128], strides = [1, 1]} : vector<64x128xf32> to vector<8x128xf32>
    %52 = arith.addf %51, %10 : vector<8x128xf32>
    %cst_25 = arith.constant dense<0.000000e+00> : vector<8x128xf32>
    %53 = tpu.matmul %48, %14, %cst_25 {dimension_numbers = #tpu.dot_dimension_numbers<[1], [0], [0], [1], [0, 0, 1, 1], [], []>} : vector<8x32xf32>, vector<32x128xf32>, vector<8x128xf32> -> vector<8x128xf32>
    %54 = vector.extract_strided_slice %52 {offsets = [0, 0], sizes = [8, 32], strides = [1, 1]} : vector<8x128xf32> to vector<8x32xf32>
    %55 = vector.extract_strided_slice %53 {offsets = [0, 0], sizes = [8, 32], strides = [1, 1]} : vector<8x128xf32> to vector<8x32xf32>
    %56 = arith.addf %54, %55 : vector<8x32xf32>
    %57 = arith.negf %56 : vector<8x32xf32>
    %58 = math.exp %57 : vector<8x32xf32>
    %cst_26 = arith.constant 1.000000e+00 : f32
    %59 = vector.broadcast %cst_26 : f32 to vector<8x32xf32>
    %60 = arith.addf %59, %58 : vector<8x32xf32>
    %61 = arith.divf %59, %60 : vector<8x32xf32>
    %62 = vector.extract_strided_slice %52 {offsets = [0, 32], sizes = [8, 32], strides = [1, 1]} : vector<8x128xf32> to vector<8x32xf32>
    %63 = vector.extract_strided_slice %53 {offsets = [0, 32], sizes = [8, 32], strides = [1, 1]} : vector<8x128xf32> to vector<8x32xf32>
    %64 = arith.addf %62, %63 : vector<8x32xf32>
    %65 = arith.negf %64 : vector<8x32xf32>
    %66 = math.exp %65 : vector<8x32xf32>
    %cst_27 = arith.constant 1.000000e+00 : f32
    %67 = vector.broadcast %cst_27 : f32 to vector<8x32xf32>
    %68 = arith.addf %67, %66 : vector<8x32xf32>
    %69 = arith.divf %67, %68 : vector<8x32xf32>
    %70 = vector.extract_strided_slice %52 {offsets = [0, 64], sizes = [8, 32], strides = [1, 1]} : vector<8x128xf32> to vector<8x32xf32>
    %71 = vector.extract_strided_slice %53 {offsets = [0, 64], sizes = [8, 32], strides = [1, 1]} : vector<8x128xf32> to vector<8x32xf32>
    %72 = vector.broadcast %15 : vector<1x32xf32> to vector<8x32xf32>
    %73 = arith.addf %71, %72 : vector<8x32xf32>
    %74 = arith.mulf %61, %73 : vector<8x32xf32>
    %75 = arith.addf %70, %74 : vector<8x32xf32>
    %76 = math.tanh %75 : vector<8x32xf32>
    %cst_28 = arith.constant 1.000000e+00 : f32
    %77 = vector.broadcast %cst_28 : f32 to vector<8x32xf32>
    %78 = arith.subf %77, %69 : vector<8x32xf32>
    %79 = arith.mulf %78, %76 : vector<8x32xf32>
    %80 = arith.mulf %69, %48 : vector<8x32xf32>
    %81 = arith.addf %79, %80 : vector<8x32xf32>
    %cst_29 = arith.constant 0.000000e+00 : f32
    %82 = vector.broadcast %cst_29 : f32 to vector<8x32xf32>
    %83 = arith.maximumf %81, %82 : vector<8x32xf32>
    %84 = vector.extract_strided_slice %13 {offsets = [16, 0], sizes = [8, 128], strides = [1, 1]} : vector<64x128xf32> to vector<8x128xf32>
    %85 = arith.addf %84, %10 : vector<8x128xf32>
    %cst_30 = arith.constant dense<0.000000e+00> : vector<8x128xf32>
    %86 = tpu.matmul %81, %14, %cst_30 {dimension_numbers = #tpu.dot_dimension_numbers<[1], [0], [0], [1], [0, 0, 1, 1], [], []>} : vector<8x32xf32>, vector<32x128xf32>, vector<8x128xf32> -> vector<8x128xf32>
    %87 = vector.extract_strided_slice %85 {offsets = [0, 0], sizes = [8, 32], strides = [1, 1]} : vector<8x128xf32> to vector<8x32xf32>
    %88 = vector.extract_strided_slice %86 {offsets = [0, 0], sizes = [8, 32], strides = [1, 1]} : vector<8x128xf32> to vector<8x32xf32>
    %89 = arith.addf %87, %88 : vector<8x32xf32>
    %90 = arith.negf %89 : vector<8x32xf32>
    %91 = math.exp %90 : vector<8x32xf32>
    %cst_31 = arith.constant 1.000000e+00 : f32
    %92 = vector.broadcast %cst_31 : f32 to vector<8x32xf32>
    %93 = arith.addf %92, %91 : vector<8x32xf32>
    %94 = arith.divf %92, %93 : vector<8x32xf32>
    %95 = vector.extract_strided_slice %85 {offsets = [0, 32], sizes = [8, 32], strides = [1, 1]} : vector<8x128xf32> to vector<8x32xf32>
    %96 = vector.extract_strided_slice %86 {offsets = [0, 32], sizes = [8, 32], strides = [1, 1]} : vector<8x128xf32> to vector<8x32xf32>
    %97 = arith.addf %95, %96 : vector<8x32xf32>
    %98 = arith.negf %97 : vector<8x32xf32>
    %99 = math.exp %98 : vector<8x32xf32>
    %cst_32 = arith.constant 1.000000e+00 : f32
    %100 = vector.broadcast %cst_32 : f32 to vector<8x32xf32>
    %101 = arith.addf %100, %99 : vector<8x32xf32>
    %102 = arith.divf %100, %101 : vector<8x32xf32>
    %103 = vector.extract_strided_slice %85 {offsets = [0, 64], sizes = [8, 32], strides = [1, 1]} : vector<8x128xf32> to vector<8x32xf32>
    %104 = vector.extract_strided_slice %86 {offsets = [0, 64], sizes = [8, 32], strides = [1, 1]} : vector<8x128xf32> to vector<8x32xf32>
    %105 = vector.broadcast %15 : vector<1x32xf32> to vector<8x32xf32>
    %106 = arith.addf %104, %105 : vector<8x32xf32>
    %107 = arith.mulf %94, %106 : vector<8x32xf32>
    %108 = arith.addf %103, %107 : vector<8x32xf32>
    %109 = math.tanh %108 : vector<8x32xf32>
    %cst_33 = arith.constant 1.000000e+00 : f32
    %110 = vector.broadcast %cst_33 : f32 to vector<8x32xf32>
    %111 = arith.subf %110, %102 : vector<8x32xf32>
    %112 = arith.mulf %111, %109 : vector<8x32xf32>
    %113 = arith.mulf %102, %81 : vector<8x32xf32>
    %114 = arith.addf %112, %113 : vector<8x32xf32>
    %cst_34 = arith.constant 0.000000e+00 : f32
    %115 = vector.broadcast %cst_34 : f32 to vector<8x32xf32>
    %116 = arith.maximumf %114, %115 : vector<8x32xf32>
    %117 = vector.extract_strided_slice %13 {offsets = [24, 0], sizes = [8, 128], strides = [1, 1]} : vector<64x128xf32> to vector<8x128xf32>
    %118 = arith.addf %117, %10 : vector<8x128xf32>
    %cst_35 = arith.constant dense<0.000000e+00> : vector<8x128xf32>
    %119 = tpu.matmul %114, %14, %cst_35 {dimension_numbers = #tpu.dot_dimension_numbers<[1], [0], [0], [1], [0, 0, 1, 1], [], []>} : vector<8x32xf32>, vector<32x128xf32>, vector<8x128xf32> -> vector<8x128xf32>
    %120 = vector.extract_strided_slice %118 {offsets = [0, 0], sizes = [8, 32], strides = [1, 1]} : vector<8x128xf32> to vector<8x32xf32>
    %121 = vector.extract_strided_slice %119 {offsets = [0, 0], sizes = [8, 32], strides = [1, 1]} : vector<8x128xf32> to vector<8x32xf32>
    %122 = arith.addf %120, %121 : vector<8x32xf32>
    %123 = arith.negf %122 : vector<8x32xf32>
    %124 = math.exp %123 : vector<8x32xf32>
    %cst_36 = arith.constant 1.000000e+00 : f32
    %125 = vector.broadcast %cst_36 : f32 to vector<8x32xf32>
    %126 = arith.addf %125, %124 : vector<8x32xf32>
    %127 = arith.divf %125, %126 : vector<8x32xf32>
    %128 = vector.extract_strided_slice %118 {offsets = [0, 32], sizes = [8, 32], strides = [1, 1]} : vector<8x128xf32> to vector<8x32xf32>
    %129 = vector.extract_strided_slice %119 {offsets = [0, 32], sizes = [8, 32], strides = [1, 1]} : vector<8x128xf32> to vector<8x32xf32>
    %130 = arith.addf %128, %129 : vector<8x32xf32>
    %131 = arith.negf %130 : vector<8x32xf32>
    %132 = math.exp %131 : vector<8x32xf32>
    %cst_37 = arith.constant 1.000000e+00 : f32
    %133 = vector.broadcast %cst_37 : f32 to vector<8x32xf32>
    %134 = arith.addf %133, %132 : vector<8x32xf32>
    %135 = arith.divf %133, %134 : vector<8x32xf32>
    %136 = vector.extract_strided_slice %118 {offsets = [0, 64], sizes = [8, 32], strides = [1, 1]} : vector<8x128xf32> to vector<8x32xf32>
    %137 = vector.extract_strided_slice %119 {offsets = [0, 64], sizes = [8, 32], strides = [1, 1]} : vector<8x128xf32> to vector<8x32xf32>
    %138 = vector.broadcast %15 : vector<1x32xf32> to vector<8x32xf32>
    %139 = arith.addf %137, %138 : vector<8x32xf32>
    %140 = arith.mulf %127, %139 : vector<8x32xf32>
    %141 = arith.addf %136, %140 : vector<8x32xf32>
    %142 = math.tanh %141 : vector<8x32xf32>
    %cst_38 = arith.constant 1.000000e+00 : f32
    %143 = vector.broadcast %cst_38 : f32 to vector<8x32xf32>
    %144 = arith.subf %143, %135 : vector<8x32xf32>
    %145 = arith.mulf %144, %142 : vector<8x32xf32>
    %146 = arith.mulf %135, %114 : vector<8x32xf32>
    %147 = arith.addf %145, %146 : vector<8x32xf32>
    %cst_39 = arith.constant 0.000000e+00 : f32
    %148 = vector.broadcast %cst_39 : f32 to vector<8x32xf32>
    %149 = arith.maximumf %147, %148 : vector<8x32xf32>
    %150 = vector.extract_strided_slice %13 {offsets = [32, 0], sizes = [8, 128], strides = [1, 1]} : vector<64x128xf32> to vector<8x128xf32>
    %151 = arith.addf %150, %10 : vector<8x128xf32>
    %cst_40 = arith.constant dense<0.000000e+00> : vector<8x128xf32>
    %152 = tpu.matmul %147, %14, %cst_40 {dimension_numbers = #tpu.dot_dimension_numbers<[1], [0], [0], [1], [0, 0, 1, 1], [], []>} : vector<8x32xf32>, vector<32x128xf32>, vector<8x128xf32> -> vector<8x128xf32>
    %153 = vector.extract_strided_slice %151 {offsets = [0, 0], sizes = [8, 32], strides = [1, 1]} : vector<8x128xf32> to vector<8x32xf32>
    %154 = vector.extract_strided_slice %152 {offsets = [0, 0], sizes = [8, 32], strides = [1, 1]} : vector<8x128xf32> to vector<8x32xf32>
    %155 = arith.addf %153, %154 : vector<8x32xf32>
    %156 = arith.negf %155 : vector<8x32xf32>
    %157 = math.exp %156 : vector<8x32xf32>
    %cst_41 = arith.constant 1.000000e+00 : f32
    %158 = vector.broadcast %cst_41 : f32 to vector<8x32xf32>
    %159 = arith.addf %158, %157 : vector<8x32xf32>
    %160 = arith.divf %158, %159 : vector<8x32xf32>
    %161 = vector.extract_strided_slice %151 {offsets = [0, 32], sizes = [8, 32], strides = [1, 1]} : vector<8x128xf32> to vector<8x32xf32>
    %162 = vector.extract_strided_slice %152 {offsets = [0, 32], sizes = [8, 32], strides = [1, 1]} : vector<8x128xf32> to vector<8x32xf32>
    %163 = arith.addf %161, %162 : vector<8x32xf32>
    %164 = arith.negf %163 : vector<8x32xf32>
    %165 = math.exp %164 : vector<8x32xf32>
    %cst_42 = arith.constant 1.000000e+00 : f32
    %166 = vector.broadcast %cst_42 : f32 to vector<8x32xf32>
    %167 = arith.addf %166, %165 : vector<8x32xf32>
    %168 = arith.divf %166, %167 : vector<8x32xf32>
    %169 = vector.extract_strided_slice %151 {offsets = [0, 64], sizes = [8, 32], strides = [1, 1]} : vector<8x128xf32> to vector<8x32xf32>
    %170 = vector.extract_strided_slice %152 {offsets = [0, 64], sizes = [8, 32], strides = [1, 1]} : vector<8x128xf32> to vector<8x32xf32>
    %171 = vector.broadcast %15 : vector<1x32xf32> to vector<8x32xf32>
    %172 = arith.addf %170, %171 : vector<8x32xf32>
    %173 = arith.mulf %160, %172 : vector<8x32xf32>
    %174 = arith.addf %169, %173 : vector<8x32xf32>
    %175 = math.tanh %174 : vector<8x32xf32>
    %cst_43 = arith.constant 1.000000e+00 : f32
    %176 = vector.broadcast %cst_43 : f32 to vector<8x32xf32>
    %177 = arith.subf %176, %168 : vector<8x32xf32>
    %178 = arith.mulf %177, %175 : vector<8x32xf32>
    %179 = arith.mulf %168, %147 : vector<8x32xf32>
    %180 = arith.addf %178, %179 : vector<8x32xf32>
    %cst_44 = arith.constant 0.000000e+00 : f32
    %181 = vector.broadcast %cst_44 : f32 to vector<8x32xf32>
    %182 = arith.maximumf %180, %181 : vector<8x32xf32>
    %183 = vector.extract_strided_slice %13 {offsets = [40, 0], sizes = [8, 128], strides = [1, 1]} : vector<64x128xf32> to vector<8x128xf32>
    %184 = arith.addf %183, %10 : vector<8x128xf32>
    %cst_45 = arith.constant dense<0.000000e+00> : vector<8x128xf32>
    %185 = tpu.matmul %180, %14, %cst_45 {dimension_numbers = #tpu.dot_dimension_numbers<[1], [0], [0], [1], [0, 0, 1, 1], [], []>} : vector<8x32xf32>, vector<32x128xf32>, vector<8x128xf32> -> vector<8x128xf32>
    %186 = vector.extract_strided_slice %184 {offsets = [0, 0], sizes = [8, 32], strides = [1, 1]} : vector<8x128xf32> to vector<8x32xf32>
    %187 = vector.extract_strided_slice %185 {offsets = [0, 0], sizes = [8, 32], strides = [1, 1]} : vector<8x128xf32> to vector<8x32xf32>
    %188 = arith.addf %186, %187 : vector<8x32xf32>
    %189 = arith.negf %188 : vector<8x32xf32>
    %190 = math.exp %189 : vector<8x32xf32>
    %cst_46 = arith.constant 1.000000e+00 : f32
    %191 = vector.broadcast %cst_46 : f32 to vector<8x32xf32>
    %192 = arith.addf %191, %190 : vector<8x32xf32>
    %193 = arith.divf %191, %192 : vector<8x32xf32>
    %194 = vector.extract_strided_slice %184 {offsets = [0, 32], sizes = [8, 32], strides = [1, 1]} : vector<8x128xf32> to vector<8x32xf32>
    %195 = vector.extract_strided_slice %185 {offsets = [0, 32], sizes = [8, 32], strides = [1, 1]} : vector<8x128xf32> to vector<8x32xf32>
    %196 = arith.addf %194, %195 : vector<8x32xf32>
    %197 = arith.negf %196 : vector<8x32xf32>
    %198 = math.exp %197 : vector<8x32xf32>
    %cst_47 = arith.constant 1.000000e+00 : f32
    %199 = vector.broadcast %cst_47 : f32 to vector<8x32xf32>
    %200 = arith.addf %199, %198 : vector<8x32xf32>
    %201 = arith.divf %199, %200 : vector<8x32xf32>
    %202 = vector.extract_strided_slice %184 {offsets = [0, 64], sizes = [8, 32], strides = [1, 1]} : vector<8x128xf32> to vector<8x32xf32>
    %203 = vector.extract_strided_slice %185 {offsets = [0, 64], sizes = [8, 32], strides = [1, 1]} : vector<8x128xf32> to vector<8x32xf32>
    %204 = vector.broadcast %15 : vector<1x32xf32> to vector<8x32xf32>
    %205 = arith.addf %203, %204 : vector<8x32xf32>
    %206 = arith.mulf %193, %205 : vector<8x32xf32>
    %207 = arith.addf %202, %206 : vector<8x32xf32>
    %208 = math.tanh %207 : vector<8x32xf32>
    %cst_48 = arith.constant 1.000000e+00 : f32
    %209 = vector.broadcast %cst_48 : f32 to vector<8x32xf32>
    %210 = arith.subf %209, %201 : vector<8x32xf32>
    %211 = arith.mulf %210, %208 : vector<8x32xf32>
    %212 = arith.mulf %201, %180 : vector<8x32xf32>
    %213 = arith.addf %211, %212 : vector<8x32xf32>
    %c3_i32 = arith.constant 3 : i32
    %214 = vector.broadcast %c3_i32 : i32 to vector<8x32xi32>
    %215 = arith.cmpi slt, %16, %214 : vector<8x32xi32>
    %216 = arith.select %215, %213, %180 : vector<8x32xi1>, vector<8x32xf32>
    %cst_49 = arith.constant 0.000000e+00 : f32
    %217 = vector.broadcast %cst_49 : f32 to vector<8x32xf32>
    %218 = arith.maximumf %213, %217 : vector<8x32xf32>
    %cst_50 = arith.constant 0.000000e+00 : f32
    %219 = vector.broadcast %cst_50 : f32 to vector<8x32xf32>
    %220 = arith.select %215, %218, %219 : vector<8x32xi1>, vector<8x32xf32>
    %221 = vector.extract_strided_slice %13 {offsets = [48, 0], sizes = [8, 128], strides = [1, 1]} : vector<64x128xf32> to vector<8x128xf32>
    %222 = arith.addf %221, %10 : vector<8x128xf32>
    %cst_51 = arith.constant dense<0.000000e+00> : vector<8x128xf32>
    %223 = tpu.matmul %216, %14, %cst_51 {dimension_numbers = #tpu.dot_dimension_numbers<[1], [0], [0], [1], [0, 0, 1, 1], [], []>} : vector<8x32xf32>, vector<32x128xf32>, vector<8x128xf32> -> vector<8x128xf32>
    %224 = vector.extract_strided_slice %222 {offsets = [0, 0], sizes = [8, 32], strides = [1, 1]} : vector<8x128xf32> to vector<8x32xf32>
    %225 = vector.extract_strided_slice %223 {offsets = [0, 0], sizes = [8, 32], strides = [1, 1]} : vector<8x128xf32> to vector<8x32xf32>
    %226 = arith.addf %224, %225 : vector<8x32xf32>
    %227 = arith.negf %226 : vector<8x32xf32>
    %228 = math.exp %227 : vector<8x32xf32>
    %cst_52 = arith.constant 1.000000e+00 : f32
    %229 = vector.broadcast %cst_52 : f32 to vector<8x32xf32>
    %230 = arith.addf %229, %228 : vector<8x32xf32>
    %231 = arith.divf %229, %230 : vector<8x32xf32>
    %232 = vector.extract_strided_slice %222 {offsets = [0, 32], sizes = [8, 32], strides = [1, 1]} : vector<8x128xf32> to vector<8x32xf32>
    %233 = vector.extract_strided_slice %223 {offsets = [0, 32], sizes = [8, 32], strides = [1, 1]} : vector<8x128xf32> to vector<8x32xf32>
    %234 = arith.addf %232, %233 : vector<8x32xf32>
    %235 = arith.negf %234 : vector<8x32xf32>
    %236 = math.exp %235 : vector<8x32xf32>
    %cst_53 = arith.constant 1.000000e+00 : f32
    %237 = vector.broadcast %cst_53 : f32 to vector<8x32xf32>
    %238 = arith.addf %237, %236 : vector<8x32xf32>
    %239 = arith.divf %237, %238 : vector<8x32xf32>
    %240 = vector.extract_strided_slice %222 {offsets = [0, 64], sizes = [8, 32], strides = [1, 1]} : vector<8x128xf32> to vector<8x32xf32>
    %241 = vector.extract_strided_slice %223 {offsets = [0, 64], sizes = [8, 32], strides = [1, 1]} : vector<8x128xf32> to vector<8x32xf32>
    %242 = vector.broadcast %15 : vector<1x32xf32> to vector<8x32xf32>
    %243 = arith.addf %241, %242 : vector<8x32xf32>
    %244 = arith.mulf %231, %243 : vector<8x32xf32>
    %245 = arith.addf %240, %244 : vector<8x32xf32>
    %246 = math.tanh %245 : vector<8x32xf32>
    %cst_54 = arith.constant 1.000000e+00 : f32
    %247 = vector.broadcast %cst_54 : f32 to vector<8x32xf32>
    %248 = arith.subf %247, %239 : vector<8x32xf32>
    %249 = arith.mulf %248, %246 : vector<8x32xf32>
    %250 = arith.mulf %239, %216 : vector<8x32xf32>
    %251 = arith.addf %249, %250 : vector<8x32xf32>
    %c2_i32 = arith.constant 2 : i32
    %252 = vector.broadcast %c2_i32 : i32 to vector<8x32xi32>
    %253 = arith.cmpi slt, %16, %252 : vector<8x32xi32>
    %254 = arith.select %253, %251, %216 : vector<8x32xi1>, vector<8x32xf32>
    %cst_55 = arith.constant 0.000000e+00 : f32
    %255 = vector.broadcast %cst_55 : f32 to vector<8x32xf32>
    %256 = arith.maximumf %251, %255 : vector<8x32xf32>
    %cst_56 = arith.constant 0.000000e+00 : f32
    %257 = vector.broadcast %cst_56 : f32 to vector<8x32xf32>
    %258 = arith.select %253, %256, %257 : vector<8x32xi1>, vector<8x32xf32>
    %259 = vector.extract_strided_slice %13 {offsets = [56, 0], sizes = [8, 128], strides = [1, 1]} : vector<64x128xf32> to vector<8x128xf32>
    %260 = arith.addf %259, %10 : vector<8x128xf32>
    %cst_57 = arith.constant dense<0.000000e+00> : vector<8x128xf32>
    %261 = tpu.matmul %254, %14, %cst_57 {dimension_numbers = #tpu.dot_dimension_numbers<[1], [0], [0], [1], [0, 0, 1, 1], [], []>} : vector<8x32xf32>, vector<32x128xf32>, vector<8x128xf32> -> vector<8x128xf32>
    %262 = vector.extract_strided_slice %260 {offsets = [0, 0], sizes = [8, 32], strides = [1, 1]} : vector<8x128xf32> to vector<8x32xf32>
    %263 = vector.extract_strided_slice %261 {offsets = [0, 0], sizes = [8, 32], strides = [1, 1]} : vector<8x128xf32> to vector<8x32xf32>
    %264 = arith.addf %262, %263 : vector<8x32xf32>
    %265 = arith.negf %264 : vector<8x32xf32>
    %266 = math.exp %265 : vector<8x32xf32>
    %cst_58 = arith.constant 1.000000e+00 : f32
    %267 = vector.broadcast %cst_58 : f32 to vector<8x32xf32>
    %268 = arith.addf %267, %266 : vector<8x32xf32>
    %269 = arith.divf %267, %268 : vector<8x32xf32>
    %270 = vector.extract_strided_slice %260 {offsets = [0, 32], sizes = [8, 32], strides = [1, 1]} : vector<8x128xf32> to vector<8x32xf32>
    %271 = vector.extract_strided_slice %261 {offsets = [0, 32], sizes = [8, 32], strides = [1, 1]} : vector<8x128xf32> to vector<8x32xf32>
    %272 = arith.addf %270, %271 : vector<8x32xf32>
    %273 = arith.negf %272 : vector<8x32xf32>
    %274 = math.exp %273 : vector<8x32xf32>
    %cst_59 = arith.constant 1.000000e+00 : f32
    %275 = vector.broadcast %cst_59 : f32 to vector<8x32xf32>
    %276 = arith.addf %275, %274 : vector<8x32xf32>
    %277 = arith.divf %275, %276 : vector<8x32xf32>
    %278 = vector.extract_strided_slice %260 {offsets = [0, 64], sizes = [8, 32], strides = [1, 1]} : vector<8x128xf32> to vector<8x32xf32>
    %279 = vector.extract_strided_slice %261 {offsets = [0, 64], sizes = [8, 32], strides = [1, 1]} : vector<8x128xf32> to vector<8x32xf32>
    %280 = vector.broadcast %15 : vector<1x32xf32> to vector<8x32xf32>
    %281 = arith.addf %279, %280 : vector<8x32xf32>
    %282 = arith.mulf %269, %281 : vector<8x32xf32>
    %283 = arith.addf %278, %282 : vector<8x32xf32>
    %284 = math.tanh %283 : vector<8x32xf32>
    %cst_60 = arith.constant 1.000000e+00 : f32
    %285 = vector.broadcast %cst_60 : f32 to vector<8x32xf32>
    %286 = arith.subf %285, %277 : vector<8x32xf32>
    %287 = arith.mulf %286, %284 : vector<8x32xf32>
    %288 = arith.mulf %277, %254 : vector<8x32xf32>
    %289 = arith.addf %287, %288 : vector<8x32xf32>
    %c1_i32 = arith.constant 1 : i32
    %290 = vector.broadcast %c1_i32 : i32 to vector<8x32xi32>
    %291 = arith.cmpi slt, %16, %290 : vector<8x32xi32>
    %cst_61 = arith.constant 0.000000e+00 : f32
    %292 = vector.broadcast %cst_61 : f32 to vector<8x32xf32>
    %293 = arith.maximumf %289, %292 : vector<8x32xf32>
    %cst_62 = arith.constant 0.000000e+00 : f32
    %294 = vector.broadcast %cst_62 : f32 to vector<8x32xf32>
    %295 = arith.select %291, %293, %294 : vector<8x32xi1>, vector<8x32xf32>
    %296 = tpu.concatenate %50, %83, %116, %149, %182, %220, %258, %295 in 0 : vector<8x32xf32>, vector<8x32xf32>, vector<8x32xf32>, vector<8x32xf32>, vector<8x32xf32>, vector<8x32xf32>, vector<8x32xf32>, vector<8x32xf32> -> vector<64x32xf32>
    %c0_63 = arith.constant 0 : index
    %c0_64 = arith.constant 0 : index
    %297 = vector.load %arg9[%c0_63, %c0_64] : memref<32x128xf32, #tpu.memory_space<vmem>>, vector<32x128xf32>
    %cst_65 = arith.constant dense<0.000000e+00> : vector<64x128xf32>
    %298 = tpu.matmul %296, %297, %cst_65 {dimension_numbers = #tpu.dot_dimension_numbers<[1], [0], [0], [1], [0, 0, 1, 1], [], []>} : vector<64x32xf32>, vector<32x128xf32>, vector<64x128xf32> -> vector<64x128xf32>
    %c0_66 = arith.constant 0 : index
    %c0_67 = arith.constant 0 : index
    %299 = vector.load %arg10[%c0_66, %c0_67] : memref<1x128xf32, #tpu.memory_space<vmem>>, vector<1x128xf32>
    %300 = vector.broadcast %299 : vector<1x128xf32> to vector<64x128xf32>
    %301 = arith.addf %298, %300 : vector<64x128xf32>
    %c0_68 = arith.constant 0 : index
    %c0_69 = arith.constant 0 : index
    %302 = vector.load %arg11[%c0_68, %c0_69] : memref<64x128xf32, #tpu.memory_space<vmem>>, vector<64x128xf32>
    tpu.vector_store %arg11[%c0_68, %c0_69], %301 {strides = array<i32>} : memref<64x128xf32, #tpu.memory_space<vmem>>, vector<64x128xf32>,
    return
  }
}

</mosaic_0001>

<bundles_post_ra>
// kernel: decoder_forward.1
= control target key start
LH: loop header
LB: loop body
LE: loop exit
PB: predicated region body
PF: predicated region fallthrough
CT: control target
= control target key end

     0   :  { %v1783_v0 = vmov 0.0|0.0   ;;  %vm1784_vm0 = vmmov 0   ;;  %v1785_v4 = vmov 0.0   ;;  %vm139_vm1 = vcmask 261120   ;;  %s1786_s13 = smov 64   ;;  %s2178_s2 = inlined_call_operand.vmem [shape: f32[64,32], index: 2, kind: input, shape index: {}]   ;;  %s2179_s4 = inlined_call_operand.vmem [shape: f32[32,128], index: 4, kind: input, shape index: {}]   ;;  %s2180_s0 = inlined_call_operand.vmem [shape: f32[64,32], index: 0, kind: input, shape index: {}]   ;;  %s2181_s5 = inlined_call_operand.vmem [shape: f32[32,128], index: 5, kind: input, shape index: {}]   ;;  %s2182_s1 = inlined_call_operand.vmem [shape: f32[8,64], index: 1, kind: input, shape index: {}]   ;;  %s2183_s7 = inlined_call_operand.vmem [shape: f32[32,128], index: 7, kind: input, shape index: {}]   ;;  %s2184_s8 = inlined_call_operand.vmem [shape: f32[1,32], index: 8, kind: input, shape index: {}]   ;;  %s2185_s3 = inlined_call_operand.vmem [shape: f32[1,32], index: 3, kind: input, shape index: {}]   ;;  %s2186_s6 = inlined_call_operand.vmem [shape: f32[1,128], index: 6, kind: input, shape index: {}]   ;;  %s2187_s9 = inlined_call_operand.vmem [shape: f32[32,128], index: 9, kind: input, shape index: {}]   ;;  %s2188_s10 = inlined_call_operand.vmem [shape: f32[1,128], index: 10, kind: input, shape index: {}]   ;;  %s2189_s11 = inlined_call_operand.vmem [shape: f32[64,128], index: 11, kind: output, shape index: {}]  }
   0x1   :  { %1648 = vmatprep.subr.bf16.mxu0 %v1783_v0  ;;  %v39_v1 = vld [vmem:[%s2178_s2] sm:$0xff]  ;;  %v40_v2 = vld [vmem:[%s2178_s2 + $0x8] sm:$0xff]  ;;  %v41_v3 = vld [vmem:[%s2178_s2 + $0x10] sm:$0xff]  ;;  %1506 = vmatprep.mubr.msk.f32.mxu0 %vm1784_vm0, %v1785_v4  ;;  %vm54_vm2 = vcmask 523264  }
   0x2   :  { %v1649_v5 = vpack.c.bf16 %v40_v2, %v39_v1  ;;  %v42_v6 = vld [vmem:[%s2178_s2 + $0x18] sm:$0xff]  ;;  %v43_v7 = vld [vmem:[%s2178_s2 + $0x20] sm:$0xff]  ;;  %v222_v10 = vld [vmem:[%s2179_s4 + $0x8] sm:$0xff] }
   0x3   :  { %v1652_v8 = vpack.c.bf16 %v42_v6, %v41_v3  ;;  %v221_v9 = vld [vmem:[%s2179_s4] sm:$0xff]  ;;  %v223_v11 = vld [vmem:[%s2179_s4 + $0x10] sm:$0xff]  ;;  %v44_v12 = vld [vmem:[%s2178_s2 + $0x28] sm:$0xff] }
   0x4   :  { %1650 = vmatpush3.bf16.msra.mxu0 %v1649_v5  ;;  %v1666_v13 = vpack.c.bf16 %v222_v10, %v221_v9  ;;  %v224_v14 = vld [vmem:[%s2179_s4 + $0x18] sm:$0xff]  ;;  %v213_v15 = vld [vmem:[%s2180_s0] sm:$0xff]  ;;  %v1655_v17 = vpack.c.bf16 %v44_v12, %v43_v7  ;;  %v45_v18 = vld [vmem:[%s2178_s2 + $0x30] sm:$0xff] }
   0x5   :  { %1651 = vmatprep.subr.bf16.mxu0 %v1783_v0  ;;  %v1670_v16 = vpack.c.bf16 %v224_v14, %v223_v11  ;;  %1528 = vmatprep.mubr.msk.f32.mxu1 %vm139_vm1, %v213_v15  ;;  %v46_v19 = vld [vmem:[%s2178_s2 + $0x38] sm:$0xff]  ;;  %v214_v21 = vld [vmem:[%s2180_s0 + $0x8] sm:$0xff]  ;;  %v128_v22 = vld [vmem:[%s2181_s5] sm:$0xff] }
   0x6   :  { %1667 = vmatprep.subr.bf16.mxu1 %v1666_v13  ;;  %v1658_v20 = vpack.c.bf16 %v46_v19, %v45_v18  ;;  %v129_v23 = vld [vmem:[%s2181_s5 + $0x8] sm:$0xff]  ;;  %v215_v24 = vld [vmem:[%s2180_s0 + $0x10] sm:$0xff]  ;;  %v38_v25 = vld [vmem:[%s2182_s1] sm:$0xff] }
   0x7   :  { %1669 = vmatpush3.bf16.msra.mxu1 %v1666_v13  ;;  %v1661_v26 = vpack.c.bf16 %v129_v23, %v128_v22  ;;  %v216_v27 = vld [vmem:[%s2180_s0 + $0x18] sm:$0xff]  ;;  %v130_v28 = vld [vmem:[%s2181_s5 + $0x10] sm:$0xff]  ;;  %v217_v30 = vld [vmem:[%s2180_s0 + $0x20] sm:$0xff] }
   0x8   :  { %1653 = vmatpush3.bf16.msra.mxu0 %v1652_v8  ;;  %1671 = vmatprep.subr.bf16.mxu1 %v1670_v16  ;;  %v131_v29 = vld [vmem:[%s2181_s5 + $0x18] sm:$0xff]  ;;  %v218_v32 = vld [vmem:[%s2180_s0 + $0x28] sm:$0xff]  ;;  %v354_v33 = vld [vmem:[%s2183_s7] sm:$0xff] }
   0x9   :  { %1654 = vmatprep.subr.bf16.mxu0 %v1783_v0  ;;  %v1664_v31 = vpack.c.bf16 %v131_v29, %v130_v28  ;;  %v355_v34 = vld [vmem:[%s2183_s7 + $0x8] sm:$0xff]  ;;  %v219_v36 = vld [vmem:[%s2180_s0 + $0x30] sm:$0xff]  ;;  %v220_v37 = vld [vmem:[%s2180_s0 + $0x38] sm:$0xff] }
   0xa   :  { %v1941_v35 = vpack.c.bf16 %v355_v34, %v354_v33  ;;  %v356_v38 = vld [vmem:[%s2183_s7 + $0x10] sm:$0xff]  ;;  %v357_v39 = vld [vmem:[%s2183_s7 + $0x18] sm:$0xff]  ;;  %v1388_v41 = vld [vmem:[%s2184_s8] ss:$0 sm:$0xff] }
   0xb   :  { %1673 = vmatpush3.bf16.msra.mxu1 %v1670_v16  ;;  %v1959_v40 = vpack.c.bf16 %v357_v39, %v356_v38  ;;  %447 = vrot.lane.b32.xlu0 %v1388_v41, %s1786_s13  ;;  %v1375_v44 = vld [vmem:[%s2185_s3] ss:$0 sm:$0xff] }
   0xc   :  { %1656 = vmatpush3.bf16.msra.mxu0 %v1655_v17  ;;  %1686 = vmatprep.subr.bf16.mxu1 %v1783_v0  ;;  %v1377_v54 = vld [vmem:[%s2186_s6] ss:$0 sm:$0xff]  ;;  %s1787_s6 = smov 96  }
   0xd   :  { %1657 = vmatprep.subr.bf16.mxu0 %v1783_v0 }
   0xe   :  { %1529 = vmatmul.mubr.msk.f32.vlgmr.msra.gmra.mrb[0].mxu1 %vm139_vm1, %v214_v21 }
   0xf   :  { %1531 = vmatprep.mubr.msk.f32.mxu1 %vm139_vm1, %v215_v24  ;;  %1688 = vmatpush3.bf16.msra.mxu1 %v1941_v35 }
  0x10   :  { %1659 = vmatpush3.bf16.msra.mxu0 %v1658_v20  ;;  %1689 = vmatprep.subr.bf16.mxu1 %v1783_v0 }
  0x11   :  { %1660 = vmatprep.subr.bf16.mxu0 %v1783_v0 }
  0x12   :  { %1532 = vmatmul.mubr.msk.f32.gmra.mrb[2].mxu1 %vm139_vm1, %v216_v27 }
  0x13   :  { %1507 = vmatmul.mubr.msk.f32.vlgmr.msra.gmra.mrb[0].mxu0 %vm54_vm2, %v38_v25  ;;  %1534 = vmatprep.mubr.msk.f32.mxu1 %vm139_vm1, %v217_v30 }
  0x14   :  { %1662 = vmatpush3.bf16.msra.mxu0 %v1661_v26  ;;  %1517 = vmatprep.mubr.msk.f32.mxu0 %vm1784_vm0, %v1785_v4 }
  0x15   :  { %1663 = vmatprep.subr.bf16.mxu0 %v1783_v0  ;;  %1691 = vmatpush3.bf16.msra.mxu1 %v1959_v40 }
  0x16   :  { %1535 = vmatmul.mubr.msk.f32.gmra.mrb[4].mxu1 %vm139_vm1, %v218_v32  ;;  %1698 = vmatprep.subr.bf16.mxu1 %v1783_v0 }
  0x17   :  { %1537 = vmatprep.mubr.msk.f32.mxu1 %vm139_vm1, %v219_v36 }
  0x18   :  { %1665 = vmatpush3.bf16.msra.mxu0 %v1664_v31 }
  0x19   :  { %1674 = vmatprep.subr.bf16.mxu0 %v1783_v0 }
  0x1a   :  { %1538 = vmatmul.mubr.msk.f32.gmra.mrb[6].mxu1 %vm139_vm1, %v220_v37 }
  0x1b   :  { %1570 = vmatprep.mubr.msk.f32.mxu1 %vm1784_vm0, %v1785_v4 }
  0x7d   :  { %v2001_v3 = vpop.permute.xlu0 %447 }
  0xe1   :  { %v1530_v42 = vpop.f32.mrb[0].mxu1 }
  0xe2   :  { %v315_v43 = vpop.f32.mrb[1].mxu1 }
  0xe5   :  { %v1533_v46 = vpop.f32.mrb[2].mxu1 }
  0xe6   :  { %v124_v45 = vpop.f32.mrb[0].mxu0  ;;  %v325_v49 = vpop.f32.mrb[3].mxu1 }
  0xe7   :  { %v125_v47 = vadd.f32 %v1375_v44, %v124_v45  ;;  %v1508_v48 = vpop.f32.mrb[1].mxu0 }
  0xe9   :  { %1518 = vmatmul.mubr.msk.f32.vlgmr.msra.gmra.mrb[2].mxu0 %vm139_vm1, %v125_v47  ;;  %v1536_v50 = vpop.f32.mrb[4].mxu1 }
  0xea   :  { %1676 = vmatpush3.bf16.msra.mxu0 %v1941_v35  ;;  %1548 = vmatprep.mubr.msk.f32.mxu0 %vm1784_vm0, %v1785_v4  ;;  %v335_v51 = vpop.f32.mrb[5].mxu1 }
  0xeb   :  { %1677 = vmatprep.subr.bf16.mxu0 %v1783_v0 }
  0xed   :  { %v1539_v52 = vpop.f32.mrb[6].mxu1 }
  0xee   :  { %1679 = vmatpush3.bf16.msra.mxu0 %v1959_v40  ;;  %v345_v53 = vpop.f32.mrb[7].mxu1 }
  0xef   :  { %1680 = vmatprep.subr.bf16.mxu0 %v1783_v0 }
  0xf1   :  { %1549 = vmatmul.mubr.f32.vlgmr.msra.gmra.mrb[4].mxu0 %v1785_v4 }
  0xf2   :  { %1682 = vmatpush3.bf16.msra.mxu0 %v1941_v35  ;;  %1559 = vmatprep.mubr.msk.f32.mxu0 %vm1784_vm0, %v1785_v4 }
  0xf3   :  { %1683 = vmatprep.subr.bf16.mxu0 %v1783_v0 }
  0xf6   :  { %1685 = vmatpush3.bf16.msra.mxu0 %v1959_v40 }
  0xf7   :  { %1692 = vmatprep.subr.bf16.mxu0 %v1783_v0 }
 0x1bc   :  { %v209_v55 = vpop.f32.mrb[2].mxu0 }
 0x1bd   :  { %v210_v56 = vadd.f32 %v1377_v54, %v209_v55  ;;  %v1519_v57 = vpop.f32.mrb[3].mxu0 }
 0x1bf   :  { %v1989_v58 = vadd.f32 %v335_v51, %v210_v56  ;;  %v1991_v59 = vadd.f32 %v1539_v52, %v210_v56  ;;  %v1993_v60 = vadd.f32 %v345_v53, %v210_v56  ;;  %v361_v61 = vadd.f32 %v315_v43, %v210_v56 }
 0x1c0   :  { %v471_v62 = vadd.f32 %v1530_v42, %v210_v56  ;;  %v1995_v63 = vadd.f32 %v325_v49, %v210_v56  ;;  %v1997_v1 = vadd.f32 %v1533_v46, %v210_v56  ;;  %v1999_v2 = vadd.f32 %v1536_v50, %v210_v56 }
 0x1c4   :  { %v431_v5 = vpop.f32.mrb[4].mxu0 }
 0x1c5   :  { %v450_v6 = vadd.f32 %v2001_v3, %v431_v5  ;;  %v1550_v7 = vpop.f32.mrb[5].mxu0  ;;  %v435_v8 = vadd.f32 %v431_v5, %v361_v61 }
 0x1c7   :  { %452 = vrot.lane.b32.xlu0 %v450_v6, %s1786_s13  ;;  %v1387_v9 = vmul.f32 -1.442695, %v435_v8 }
 0x1c9   :  { %1735 = vpow2.f32 %v1387_v9 }
 0x1d3   :  { %v1736_v10 = vpop.eup %1735 }
 0x1d4   :  { %v439_v11 = vadd.f32 1.0, %v1736_v10 }
 0x1d6   :  { %1737 = vrcp.f32 %v439_v11 }
 0x1e0   :  { %v1738_v12 = vpop.eup %1737 }
 0x1e1   :  { %v462_v18 = vsub.f32 1.0, %v1738_v12  ;;  %v468_v20 = vmul.f32 0.0, %v1738_v12 }
 0x239   :  { %v453_v13 = vpop.permute.xlu0 %452 }
 0x23a   :  { %v455_v14 = vmul.f32 %v1738_v12, %v453_v13 }
 0x23c   :  { %457 = vrot.lane.b32.xlu1 %v455_v14, %s1786_s13 }
 0x2ae   :  { %v458_v15 = vpop.permute.xlu1 %457 }
 0x2af   :  { %v460_v16 = vadd.f32 %v458_v15, %v361_v61 }
 0x2b1   :  { %1739 = vtanh.f32 %v460_v16 }
 0x2bb   :  { %v1740_v17 = vpop.eup %1739 }
 0x2bc   :  { %464 = vrot.lane.b32.xlu1 %v1740_v17, %s1787_s6 }
 0x32e   :  { %v465_v19 = vpop.permute.xlu1 %464 }
 0x32f   :  { %v467_v21 = vmul.f32 %v465_v19, %v462_v18 }
 0x331   :  { %v2007_v22 = vadd.f32 %v468_v20, %v467_v21 }
 0x333   :  { %473 = vrot.lane.b32.xlu0 %v2007_v22, %s1787_s6 }
 0x3a5   :  { %v474_v23 = vpop.permute.xlu0 %473 }
 0x3a6   :  { %1560 = vmatmul.mubr.msk.f32.vlgmr.msra.gmra.mrb[6].mxu0 %vm139_vm1, %v474_v23 }
 0x3a7   :  { %1694 = vmatpush3.bf16.msra.mxu0 %v1941_v35  ;;  %1581 = vmatprep.mubr.msk.f32.mxu0 %vm1784_vm0, %v1785_v4 }
 0x3a8   :  { %1695 = vmatprep.subr.bf16.mxu0 %v1783_v0 }
 0x3ab   :  { %1697 = vmatpush3.bf16.msra.mxu0 %v1959_v40 }
 0x3ac   :  { %1704 = vmatprep.subr.bf16.mxu0 %v1783_v0 }
 0x479   :  { %v543_v24 = vpop.f32.mrb[6].mxu0 }
 0x47a   :  { %v554_v25 = vadd.f32 %v543_v24, %v2001_v3  ;;  %v1561_v26 = vpop.f32.mrb[7].mxu0  ;;  %v547_v27 = vadd.f32 %v543_v24, %v471_v62 }
 0x47c   :  { %556 = vrot.lane.b32.xlu1 %v554_v25, %s1786_s13  ;;  %v1390_v28 = vmul.f32 -1.442695, %v547_v27 }
 0x47e   :  { %1741 = vpow2.f32 %v1390_v28 }
 0x488   :  { %v1742_v29 = vpop.eup %1741 }
 0x489   :  { %v551_v30 = vadd.f32 1.0, %v1742_v29 }
 0x48b   :  { %1743 = vrcp.f32 %v551_v30 }
 0x495   :  { %v1744_v31 = vpop.eup %1743 }
 0x496   :  { %v566_v38 = vsub.f32 1.0, %v1744_v31  ;;  %v572_v41 = vmul.f32 %v1744_v31, %v2007_v22 }
 0x4ee   :  { %v557_v32 = vpop.permute.xlu1 %556 }
 0x4ef   :  { %v559_v33 = vmul.f32 %v1744_v31, %v557_v32 }
 0x4f1   :  { %561 = vrot.lane.b32.xlu0 %v559_v33, %s1786_s13 }
 0x563   :  { %v562_v34 = vpop.permute.xlu0 %561 }
 0x564   :  { %v564_v36 = vadd.f32 %v562_v34, %v471_v62 }
 0x566   :  { %1745 = vtanh.f32 %v564_v36 }
 0x570   :  { %v1746_v37 = vpop.eup %1745 }
 0x571   :  { %568 = vrot.lane.b32.xlu1 %v1746_v37, %s1787_s6 }
 0x5e3   :  { %v569_v39 = vpop.permute.xlu1 %568 }
 0x5e4   :  { %v571_v42 = vmul.f32 %v569_v39, %v566_v38 }
 0x5e6   :  { %v2023_v43 = vadd.f32 %v572_v41, %v571_v42 }
 0x5e8   :  { %577 = vrot.lane.b32.xlu0 %v2023_v43, %s1787_s6 }
 0x65a   :  { %v578_v44 = vpop.permute.xlu0 %577 }
 0x65b   :  { %1571 = vmatmul.mubr.msk.f32.vlgmr.msra.gmra.mrb[8].mxu1 %vm139_vm1, %v578_v44 }
 0x65c   :  { %1700 = vmatpush3.bf16.msra.mxu1 %v1941_v35  ;;  %1592 = vmatprep.mubr.msk.f32.mxu1 %vm1784_vm0, %v1785_v4 }
 0x65d   :  { %1701 = vmatprep.subr.bf16.mxu1 %v1783_v0 }
 0x660   :  { %1703 = vmatpush3.bf16.msra.mxu1 %v1959_v40 }
 0x661   :  { %1710 = vmatprep.subr.bf16.mxu1 %v1783_v0 }
 0x72e   :  { %v647_v45 = vpop.f32.mrb[8].mxu1 }
 0x72f   :  { %v658_v46 = vadd.f32 %v647_v45, %v2001_v3  ;;  %v1572_v47 = vpop.f32.mrb[9].mxu1  ;;  %v651_v48 = vadd.f32 %v647_v45, %v1995_v63 }
 0x731   :  { %660 = vrot.lane.b32.xlu1 %v658_v46, %s1786_s13  ;;  %v1392_v49 = vmul.f32 -1.442695, %v651_v48 }
 0x733   :  { %1747 = vpow2.f32 %v1392_v49 }
 0x73d   :  { %v1748_v50 = vpop.eup %1747 }
 0x73e   :  { %v655_v51 = vadd.f32 1.0, %v1748_v50 }
 0x740   :  { %1749 = vrcp.f32 %v655_v51 }
 0x74a   :  { %v1750_v52 = vpop.eup %1749 }
 0x74b   :  { %v670_v61 = vsub.f32 1.0, %v1750_v52  ;;  %v676_v5 = vmul.f32 %v1750_v52, %v2023_v43 }
 0x7a3   :  { %v661_v53 = vpop.permute.xlu1 %660 }
 0x7a4   :  { %v663_v54 = vmul.f32 %v1750_v52, %v661_v53 }
 0x7a6   :  { %665 = vrot.lane.b32.xlu0 %v663_v54, %s1786_s13 }
 0x818   :  { %v666_v55 = vpop.permute.xlu0 %665 }
 0x819   :  { %v668_v56 = vadd.f32 %v666_v55, %v1995_v63 }
 0x81b   :  { %1751 = vtanh.f32 %v668_v56 }
 0x825   :  { %v1752_v57 = vpop.eup %1751 }
 0x826   :  { %672 = vrot.lane.b32.xlu1 %v1752_v57, %s1787_s6  ;;  %v359_v57 = vlaneseq }
 0x898   :  { %v673_v62 = vpop.permute.xlu1 %672 }
 0x899   :  { %v675_v6 = vmul.f32 %v673_v62, %v670_v61  ;;  %v2092_v61 = vshrl.u32 %v359_v57, 7 }
 0x89b   :  { %v2041_v7 = vadd.f32 %v676_v5, %v675_v6  ;;  %vm990_vm3 = vcmp.lt.s32.totalorder %v2092_v61, 3  ;;  %vm1097_vm4 = vcmp.lt.s32.totalorder %v2092_v61, 2  ;;  %vm1204_vm5 = vcmp.lt.s32.totalorder %v2092_v61, 1 }
 0x89d   :  { %681 = vrot.lane.b32.xlu0 %v2041_v7, %s1787_s6 }
 0x90f   :  { %v682_v8 = vpop.permute.xlu0 %681 }
 0x910   :  { %1582 = vmatmul.mubr.msk.f32.vlgmr.msra.gmra.mrb[8].mxu0 %vm139_vm1, %v682_v8 }
 0x911   :  { %1706 = vmatpush3.bf16.msra.mxu0 %v1941_v35  ;;  %1603 = vmatprep.mubr.msk.f32.mxu0 %vm1784_vm0, %v1785_v4 }
 0x912   :  { %1707 = vmatprep.subr.bf16.mxu0 %v1783_v0 }
 0x915   :  { %1709 = vmatpush3.bf16.msra.mxu0 %v1959_v40 }
 0x916   :  { %1716 = vmatprep.subr.bf16.mxu0 %v1783_v0 }
 0x9e3   :  { %v751_v63 = vpop.f32.mrb[8].mxu0 }
 0x9e4   :  { %v762_v9 = vadd.f32 %v751_v63, %v2001_v3  ;;  %v1583_v10 = vpop.f32.mrb[9].mxu0  ;;  %v755_v11 = vadd.f32 %v751_v63, %v1997_v1 }
 0x9e6   :  { %764 = vrot.lane.b32.xlu1 %v762_v9, %s1786_s13  ;;  %v1394_v12 = vmul.f32 -1.442695, %v755_v11 }
 0x9e8   :  { %1753 = vpow2.f32 %v1394_v12 }
 0x9f2   :  { %v1754_v13 = vpop.eup %1753 }
 0x9f3   :  { %v759_v14 = vadd.f32 1.0, %v1754_v13 }
 0x9f5   :  { %1755 = vrcp.f32 %v759_v14 }
 0x9ff   :  { %v1756_v15 = vpop.eup %1755 }
 0xa00   :  { %v774_v21 = vsub.f32 1.0, %v1756_v15  ;;  %v780_v24 = vmul.f32 %v1756_v15, %v2041_v7 }
 0xa58   :  { %v765_v16 = vpop.permute.xlu1 %764 }
 0xa59   :  { %v767_v17 = vmul.f32 %v1756_v15, %v765_v16 }
 0xa5b   :  { %769 = vrot.lane.b32.xlu0 %v767_v17, %s1786_s13 }
 0xacd   :  { %v770_v18 = vpop.permute.xlu0 %769 }
 0xace   :  { %v772_v19 = vadd.f32 %v770_v18, %v1997_v1 }
 0xad0   :  { %1757 = vtanh.f32 %v772_v19 }
 0xada   :  { %v1758_v20 = vpop.eup %1757 }
 0xadb   :  { %776 = vrot.lane.b32.xlu1 %v1758_v20, %s1787_s6 }
 0xb4d   :  { %v777_v23 = vpop.permute.xlu1 %776 }
 0xb4e   :  { %v779_v25 = vmul.f32 %v777_v23, %v774_v21 }
 0xb50   :  { %v2059_v26 = vadd.f32 %v780_v24, %v779_v25 }
 0xb52   :  { %785 = vrot.lane.b32.xlu0 %v2059_v26, %s1787_s6 }
 0xbc4   :  { %v786_v27 = vpop.permute.xlu0 %785 }
 0xbc5   :  { %1593 = vmatmul.mubr.msk.f32.vlgmr.msra.gmra.mrb[10].mxu1 %vm139_vm1, %v786_v27 }
 0xbc6   :  { %1712 = vmatpush3.bf16.msra.mxu1 %v1941_v35  ;;  %1614 = vmatprep.mubr.msk.f32.mxu1 %vm1784_vm0, %v1785_v4 }
 0xbc7   :  { %1713 = vmatprep.subr.bf16.mxu1 %v1783_v0 }
 0xbca   :  { %1715 = vmatpush3.bf16.msra.mxu1 %v1959_v40 }
 0xc98   :  { %v855_v1 = vpop.f32.mrb[10].mxu1 }
 0xc99   :  { %v866_v28 = vadd.f32 %v855_v1, %v2001_v3  ;;  %v1594_v29 = vpop.f32.mrb[11].mxu1  ;;  %v859_v30 = vadd.f32 %v855_v1, %v1989_v58 }
 0xc9b   :  { %868 = vrot.lane.b32.xlu1 %v866_v28, %s1786_s13  ;;  %v1396_v31 = vmul.f32 -1.442695, %v859_v30 }
 0xc9d   :  { %1759 = vpow2.f32 %v1396_v31 }
 0xca7   :  { %v1760_v32 = vpop.eup %1759 }
 0xca8   :  { %v863_v33 = vadd.f32 1.0, %v1760_v32 }
 0xcaa   :  { %1761 = vrcp.f32 %v863_v33 }
 0xcb4   :  { %v1762_v34 = vpop.eup %1761 }
 0xcb5   :  { %v878_v42 = vsub.f32 1.0, %v1762_v34  ;;  %v884_v45 = vmul.f32 %v1762_v34, %v2059_v26 }
 0xd0d   :  { %v869_v36 = vpop.permute.xlu1 %868 }
 0xd0e   :  { %v871_v37 = vmul.f32 %v1762_v34, %v869_v36 }
 0xd10   :  { %873 = vrot.lane.b32.xlu0 %v871_v37, %s1786_s13 }
 0xd82   :  { %v874_v38 = vpop.permute.xlu0 %873 }
 0xd83   :  { %v876_v39 = vadd.f32 %v874_v38, %v1989_v58 }
 0xd85   :  { %1763 = vtanh.f32 %v876_v39 }
 0xd8f   :  { %v1764_v41 = vpop.eup %1763 }
 0xd90   :  { %880 = vrot.lane.b32.xlu1 %v1764_v41, %s1787_s6 }
 0xe02   :  { %v881_v44 = vpop.permute.xlu1 %880 }
 0xe03   :  { %v883_v46 = vmul.f32 %v881_v44, %v878_v42 }
 0xe05   :  { %v2076_v47 = vadd.f32 %v884_v45, %v883_v46 }
 0xe07   :  { %889 = vrot.lane.b32.xlu0 %v2076_v47, %s1787_s6 }
 0xe79   :  { %v890_v48 = vpop.permute.xlu0 %889 }
 0xe7a   :  { %1604 = vmatmul.mubr.msk.f32.vlgmr.msra.gmra.mrb[10].mxu0 %vm139_vm1, %v890_v48  ;;  %v470_v48 = vmax.f32 %v2007_v22, 0.0  ;;  %v1209_v22 = vld [vmem:[%s2187_s9 + $0x10] sm:$0xff] }
 0xe7b   :  { %1718 = vmatpush3.bf16.msra.mxu0 %v1941_v35  ;;  %1625 = vmatprep.mubr.msk.f32.mxu0 %vm1784_vm0, %v1785_v4 }
 0xe7c   :  { %1719 = vmatprep.subr.bf16.mxu0 %v1783_v0 }
 0xe7f   :  { %1721 = vmatpush3.bf16.msra.mxu0 %v1959_v40 }
 0xf4d   :  { %v959_v58 = vpop.f32.mrb[10].mxu0 }
 0xf4e   :  { %v970_v49 = vadd.f32 %v959_v58, %v2001_v3  ;;  %v1605_v50 = vpop.f32.mrb[11].mxu0  ;;  %v963_v51 = vadd.f32 %v959_v58, %v1999_v2  ;;  %v886_v58 = vmax.f32 %v2076_v47, 0.0 }
 0xf4f   :  { %v1208_v50 = vld [vmem:[%s2187_s9 + $0x8] sm:$0xff] }
 0xf50   :  { %972 = vrot.lane.b32.xlu1 %v970_v49, %s1786_s13  ;;  %v1398_v52 = vmul.f32 -1.442695, %v963_v51  ;;  %v1207_v49 = vld [vmem:[%s2187_s9] sm:$0xff] }
 0xf51   :  { %v1722_v51 = vpack.c.bf16 %v1208_v50, %v1207_v49 }
 0xf52   :  { %1765 = vpow2.f32 %v1398_v52 }
 0xf53   :  { %1723 = vmatprep.subr.bf16.mxu1 %v1722_v51 }
 0xf5c   :  { %v1766_v53 = vpop.eup %1765 }
 0xf5d   :  { %v967_v54 = vadd.f32 1.0, %v1766_v53 }
 0xf5f   :  { %1767 = vrcp.f32 %v967_v54 }
 0xf69   :  { %v1768_v35 = vpop.eup %1767 }
 0xf6a   :  { %v982_v62 = vsub.f32 1.0, %v1768_v35  ;;  %v988_v6 = vmul.f32 %v1768_v35, %v2076_v47 }
 0xfc2   :  { %v973_v55 = vpop.permute.xlu1 %972 }
 0xfc3   :  { %v975_v4 = vmul.f32 %v1768_v35, %v973_v55  ;;  %v574_v55 = vmax.f32 %v2023_v43, 0.0 }
 0xfc5   :  { %977 = vrot.lane.b32.xlu0 %v975_v4, %s1786_s13  ;;  %v782_v4 = vmax.f32 %v2059_v26, 0.0 }
0x1037   :  { %v978_v0 = vpop.permute.xlu0 %977 }
0x1038   :  { %v980_v40 = vadd.f32 %v978_v0, %v1999_v2 }
0x103a   :  { %1769 = vtanh.f32 %v980_v40 }
0x1044   :  { %v1770_v56 = vpop.eup %1769 }
0x1045   :  { %984 = vrot.lane.b32.xlu1 %v1770_v56, %s1787_s6 }
0x10b7   :  { %v985_v5 = vpop.permute.xlu1 %984 }
0x10b8   :  { %v987_v8 = vmul.f32 %v985_v5, %v982_v62 }
0x10ba   :  { %v989_v63 = vadd.f32 %v988_v6, %v987_v8 }
0x10bc   :  { %v991_v9 = vsel %vm990_vm3, %v989_v63, %v2076_v47  ;;  %v992_v10 = vmax.f32 %v989_v63, 0.0 }
0x10bd   :  { %996 = vrot.lane.b32.xlu0 %v991_v9, %s1787_s6 }
0x10be   :  { %v2098_v2 = vsel %vm990_vm3, %v992_v10, 0.0  ;;  %v1403_v10 = vld [vmem:[%s2188_s10] ss:$0 sm:$0xff] }
0x112f   :  { %v997_v11 = vpop.permute.xlu0 %996 }
0x1130   :  { %1615 = vmatmul.mubr.msk.f32.vlgmr.msra.gmra.mrb[12].mxu1 %vm139_vm1, %v997_v11 }
0x1131   :  { %1725 = vmatpush3.bf16.msra.mxu1 %v1722_v51 }
0x1203   :  { %v1066_v12 = vpop.f32.mrb[12].mxu1 }
0x1204   :  { %v1077_v13 = vadd.f32 %v1066_v12, %v2001_v3  ;;  %v1616_v14 = vpop.f32.mrb[13].mxu1  ;;  %v1070_v15 = vadd.f32 %v1066_v12, %v1993_v60 }
0x1206   :  { %1079 = vrot.lane.b32.xlu1 %v1077_v13, %s1786_s13  ;;  %v1400_v16 = vmul.f32 -1.442695, %v1070_v15 }
0x1208   :  { %1771 = vpow2.f32 %v1400_v16 }
0x1212   :  { %v1772_v17 = vpop.eup %1771 }
0x1213   :  { %v1074_v18 = vadd.f32 1.0, %v1772_v17 }
0x1215   :  { %1773 = vrcp.f32 %v1074_v18 }
0x121f   :  { %v1774_v19 = vpop.eup %1773 }
0x1220   :  { %v1089_v27 = vsub.f32 1.0, %v1774_v19  ;;  %v1095_v28 = vmul.f32 %v1774_v19, %v991_v9 }
0x1278   :  { %v1080_v20 = vpop.permute.xlu1 %1079 }
0x1279   :  { %v1082_v21 = vmul.f32 %v1774_v19, %v1080_v20 }
0x127b   :  { %1084 = vrot.lane.b32.xlu0 %v1082_v21, %s1786_s13 }
0x12ed   :  { %v1085_v23 = vpop.permute.xlu0 %1084 }
0x12ee   :  { %v1087_v24 = vadd.f32 %v1085_v23, %v1993_v60 }
0x12f0   :  { %1775 = vtanh.f32 %v1087_v24 }
0x12fa   :  { %v1776_v25 = vpop.eup %1775 }
0x12fb   :  { %1091 = vrot.lane.b32.xlu1 %v1776_v25, %s1787_s6 }
0x136d   :  { %v1092_v1 = vpop.permute.xlu1 %1091 }
0x136e   :  { %v1094_v29 = vmul.f32 %v1092_v1, %v1089_v27 }
0x1370   :  { %v1096_v30 = vadd.f32 %v1095_v28, %v1094_v29 }
0x1372   :  { %v1098_v31 = vsel %vm1097_vm4, %v1096_v30, %v991_v9  ;;  %v1099_v32 = vmax.f32 %v1096_v30, 0.0 }
0x1373   :  { %1103 = vrot.lane.b32.xlu0 %v1098_v31, %s1787_s6 }
0x1374   :  { %v1100_v33 = vsel %vm1097_vm4, %v1099_v32, 0.0 }
0x13e5   :  { %v1104_v34 = vpop.permute.xlu0 %1103 }
0x13e6   :  { %1626 = vmatmul.mubr.msk.f32.vlgmr.msra.gmra.mrb[12].mxu0 %vm139_vm1, %v1104_v34 }
0x14b9   :  { %v1173_v60 = vpop.f32.mrb[12].mxu0 }
0x14ba   :  { %v1184_v36 = vadd.f32 %v1173_v60, %v2001_v3  ;;  %v1627_v37 = vpop.f32.mrb[13].mxu0  ;;  %v1177_v38 = vadd.f32 %v1173_v60, %v1991_v59  ;;  %v678_v3 = vmax.f32 %v2041_v7, 0.0  ;;  %v1210_v7 = vld [vmem:[%s2187_s9 + $0x18] sm:$0xff] }
0x14bb   :  { %v1726_v47 = vpack.c.bf16 %v1210_v7, %v1209_v22 }
0x14bc   :  { %1186 = vrot.lane.b32.xlu1 %v1184_v36, %s1786_s13  ;;  %v1402_v39 = vmul.f32 -1.442695, %v1177_v38 }
0x14bd   :  { %1727 = vmatprep.subr.bf16.mxu1 %v1726_v47 }
0x14be   :  { %1777 = vpow2.f32 %v1402_v39  ;;  %1729 = vmatpush3.bf16.msra.mxu1 %v1726_v47 }
0x14c8   :  { %v1778_v41 = vpop.eup %1777 }
0x14c9   :  { %v1181_v42 = vadd.f32 1.0, %v1778_v41 }
0x14cb   :  { %1779 = vrcp.f32 %v1181_v42 }
0x14d5   :  { %v1780_v44 = vpop.eup %1779 }
0x14d6   :  { %v1202_v56 = vmul.f32 %v1780_v44, %v1098_v31 }
0x152e   :  { %v1187_v45 = vpop.permute.xlu1 %1186 }
0x152f   :  { %v1189_v46 = vmul.f32 %v1780_v44, %v1187_v45 }
0x1531   :  { %1191 = vrot.lane.b32.xlu0 %v1189_v46, %s1786_s13 }
0x1535   :  { %1226 = vrot.lane.b32.xlu0 %v470_v48, %s1787_s6 }
0x1539   :  { %1230 = vrot.lane.b32.xlu0 %v678_v3, %s1787_s6 }
0x153d   :  { %1234 = vrot.lane.b32.xlu0 %v886_v58, %s1787_s6 }
0x1541   :  { %1238 = vrot.lane.b32.xlu0 %v1100_v33, %s1787_s6 }
0x15a3   :  { %v1192_v52 = vpop.permute.xlu0 %1191 }
0x15a4   :  { %v1194_v53 = vadd.f32 %v1192_v52, %v1991_v59  ;;  %v1196_v59 = vsub.f32 1.0, %v1780_v44 }
0x15a6   :  { %1781 = vtanh.f32 %v1194_v53 }
0x15a7   :  { %v1227_v54 = vpop.permute.xlu0 %1226 }
0x15a8   :  { %1636 = vmatprep.mubr.msk.f32.mxu1 %vm139_vm1, %v1227_v54 }
0x15ab   :  { %v1231_v40 = vpop.permute.xlu0 %1230 }
0x15af   :  { %v1235_v43 = vpop.permute.xlu0 %1234 }
0x15b0   :  { %v1782_v35 = vpop.eup %1781 }
0x15b1   :  { %1198 = vrot.lane.b32.xlu1 %v1782_v35, %s1787_s6 }
0x15b3   :  { %v1239_v9 = vpop.permute.xlu0 %1238 }
0x15b5   :  { %1228 = vrot.lane.b32.xlu1 %v574_v55, %s1787_s6 }
0x15b9   :  { %1232 = vrot.lane.b32.xlu1 %v782_v4, %s1787_s6 }
0x15bd   :  { %1236 = vrot.lane.b32.xlu1 %v2098_v2, %s1787_s6 }
0x1623   :  { %v1199_v0 = vpop.permute.xlu1 %1198 }
0x1624   :  { %v1201_v57 = vmul.f32 %v1199_v0, %v1196_v59 }
0x1626   :  { %v1203_v62 = vadd.f32 %v1202_v56, %v1201_v57 }
0x1627   :  { %v1229_v5 = vpop.permute.xlu1 %1228 }
0x1628   :  { %v1205_v6 = vmax.f32 %v1203_v62, 0.0  ;;  %1637 = vmatmul.mubr.msk.f32.vlgmr.msra.gmra.mrb[14].mxu1 %vm139_vm1, %v1229_v5 }
0x1629   :  { %1639 = vmatprep.mubr.msk.f32.mxu1 %vm139_vm1, %v1231_v40 }
0x162a   :  { %v1206_v26 = vsel %vm1204_vm5, %v1205_v6, 0.0 }
0x162b   :  { %1240 = vrot.lane.b32.xlu1 %v1206_v26, %s1787_s6  ;;  %v1233_v8 = vpop.permute.xlu1 %1232 }
0x162c   :  { %1640 = vmatmul.mubr.msk.f32.gmra.mrb[16].mxu1 %vm139_vm1, %v1233_v8 }
0x162d   :  { %1642 = vmatprep.mubr.msk.f32.mxu1 %vm139_vm1, %v1235_v43 }
0x162f   :  { %v1237_v63 = vpop.permute.xlu1 %1236 }
0x1630   :  { %1643 = vmatmul.mubr.msk.f32.gmra.mrb[18].mxu1 %vm139_vm1, %v1237_v63 }
0x1631   :  { %1645 = vmatprep.mubr.msk.f32.mxu1 %vm139_vm1, %v1239_v9 }
0x169d   :  { %v1241_v61 = vpop.permute.xlu1 %1240 }
0x169e   :  { %1646 = vmatmul.mubr.msk.f32.gmra.mrb[20].mxu1 %vm139_vm1, %v1241_v61 }
0x16fb   :  { %v1638_v2 = vpop.f32.mrb[14].mxu1 }
0x16fc   :  { %v1330_v11 = vadd.f32 %v1638_v2, %v1403_v10  ;;  %v1324_v12 = vpop.f32.mrb[15].mxu1 }
0x16fd   :  { %v1325_v13 = vadd.f32 %v1403_v10, %v1324_v12 }
0x16fe   :  { %1364 = vst [vmem:[%s2189_s11 + $0x8] sm:$0xff] %v1330_v11 }
0x16ff   :  { %1363 = vst [vmem:[%s2189_s11] sm:$0xff] %v1325_v13  ;;  %v1641_v14 = vpop.f32.mrb[16].mxu1 }
0x1700   :  { %v1340_v15 = vadd.f32 %v1641_v14, %v1403_v10  ;;  %v1334_v16 = vpop.f32.mrb[17].mxu1 }
0x1701   :  { %v1335_v17 = vadd.f32 %v1403_v10, %v1334_v16 }
0x1702   :  { %1366 = vst [vmem:[%s2189_s11 + $0x18] sm:$0xff] %v1340_v15 }
0x1703   :  { %1365 = vst [vmem:[%s2189_s11 + $0x10] sm:$0xff] %v1335_v17  ;;  %v1644_v18 = vpop.f32.mrb[18].mxu1 }
0x1704   :  { %v1350_v19 = vadd.f32 %v1644_v18, %v1403_v10  ;;  %v1344_v20 = vpop.f32.mrb[19].mxu1 }
0x1705   :  { %v1345_v21 = vadd.f32 %v1403_v10, %v1344_v20 }
0x1706   :  { %1368 = vst [vmem:[%s2189_s11 + $0x28] sm:$0xff] %v1350_v19 }
0x1707   :  { %1367 = vst [vmem:[%s2189_s11 + $0x20] sm:$0xff] %v1345_v21 }
0x1771   :  { %v1647_v23 = vpop.f32.mrb[20].mxu1 }
0x1772   :  { %v1360_v24 = vadd.f32 %v1647_v23, %v1403_v10  ;;  %v1354_v25 = vpop.f32.mrb[21].mxu1 }
0x1773   :  { %v1355_v27 = vadd.f32 %v1403_v10, %v1354_v25 }
0x1774   :  { %1370 = vst [vmem:[%s2189_s11 + $0x38] sm:$0xff] %v1360_v24 }
0x1775   :  { %1369 = vst [vmem:[%s2189_s11 + $0x30] sm:$0xff] %v1355_v27 }

</bundles_post_ra>
